<compile_context>
chip_gen: v7x
topology: tpu7x:2x2x1
jax: 0.10.0
libtpu: 0.0.40
codegen_flags: <defaults>
</compile_context>

<pallas_src>
import math

import jax
import jax.numpy as jnp
from jax import lax
from jax.experimental import pallas as pl
from jax.experimental.pallas import tpu as pltpu

# ----------------------------- problem sizes ---------------------------------
B = 2          # batch
S = 8          # query sequence length
L = 8          # key/value sequence length
D = 32         # model dim
NHEAD = 4
HEAD_DIM = D // NHEAD
DIM_FF = 64
LN_EPS = 1e-5  # PyTorch LayerNorm default

BS = B * S
BL = B * L
NL = NHEAD * L          # all heads packed along the score lane axis


# ------------------------------- kernel --------------------------------------
def attention_block_kernel(acts_ref, bias_ref, wproj_ref, wffn_ref, vec_ref, out_ref):
    # Single invocation, no grid: the whole working set (~70 KB) lives in VMEM.
    acts = acts_ref[...]                       # (BS + 2*BL, D) = [q ; k ; v] rows
    q_in = acts[:BS, :]                        # (BS, D) residual input

    wproj = wproj_ref[...]                     # (D, 4D) = [Wq | Wk | Wv | Wo]
    wffn = wffn_ref[...]                       # (D+FF+NL, FF) = [W1 ; pad(W2) ; pad(Seg)]
    vec = vec_ref[...]                         # (16, FF) bias/gamma/beta/head-mask slab
    bq, bk, bv, bo = vec[0:1, :D], vec[1:2, :D], vec[2:3, :D], vec[3:4, :D]
    b1, b2 = vec[4:5, :DIM_FF], vec[5:6, :D]
    g1, be1 = vec[6:7, :D], vec[7:8, :D]
    g2, be2 = vec[8:9, :D], vec[9:10, :D]

    # --- one fused, 128-lane-wide projection for Q, K and V -------------------
    proj = jnp.dot(acts, wproj, preferred_element_type=jnp.float32)    # (48, 128)
    Q = proj[:BS, 0 * D:1 * D] + bq                                    # (BS, D)
    K = proj[BS:BS + BL, 1 * D:2 * D] + bk                             # (BL, D)
    V = proj[BS + BL:, 2 * D:3 * D] + bv                               # (BL, D)

    Q3 = Q.reshape(B, S, D)
    K3 = K.reshape(B, L, D)
    V3 = V.reshape(B, L, D)

    # --- head-expanded K / V: row block h keeps only head h's columns ---------
    # Kexp[b, h*L + l, :] = K[b, l, :] * head_mask[h]   (same construction for V).
    Kexp = jnp.concatenate([K3 * vec[10 + h:11 + h, :D] for h in range(NHEAD)], axis=1)
    Vexp = jnp.concatenate([V3 * vec[10 + h:11 + h, :D] for h in range(NHEAD)], axis=1)

    # --- scores for all heads in one batched matmul ----------------------------
    scale = 1.0 / math.sqrt(HEAD_DIM)
    s = jnp.einsum("bqd,bnd->bqn", Q3, Kexp,
                   preferred_element_type=jnp.float32)                 # (B, S, NL)
    s = s.reshape(BS, NL) * scale + bias_ref[...]                      # additive mask bias

    # --- single softmax pass over all heads ------------------------------------
    # A global (all-heads) row max is a valid per-head softmax shift.
    s = s - jnp.max(s, axis=-1, keepdims=True)
    p = jnp.exp(s)
    seg = wffn[D + DIM_FF:, :NL]                                       # (NL, NL) block-diag ones
    den = jnp.dot(p, seg, preferred_element_type=jnp.float32)          # per-lane head denominators
    p = p * pl.reciprocal(den, approx=True)

    # --- PV for all heads at once: result is already head-concatenated ---------
    attn = jnp.einsum("bqn,bnd->bqd", p.reshape(B, S, NL), Vexp,
                      preferred_element_type=jnp.float32)              # (B, S, D)
    msa = jnp.dot(attn.reshape(BS, D), wproj[:, 3 * D:4 * D],
                  preferred_element_type=jnp.float32) + bo

    # --- residual + LayerNorm1 --------------------------------------------------
    x = q_in + msa                                                     # add_q=True path
    mu = jnp.mean(x, axis=-1, keepdims=True)
    var = jnp.mean(jnp.square(x - mu), axis=-1, keepdims=True)
    x = (x - mu) * lax.rsqrt(var + LN_EPS) * g1 + be1

    # --- FFN (Linear -> ReLU -> Linear) + residual -------------------------------
    w1 = wffn[:D, :]                                                   # (D, FF)
    w2 = wffn[D:D + DIM_FF, :D]                                        # (FF, D)
    h1 = jnp.maximum(jnp.dot(x, w1, preferred_element_type=jnp.float32) + b1, 0.0)
    x = x + jnp.dot(h1, w2, preferred_element_type=jnp.float32) + b2

    # --- LayerNorm2 ---------------------------------------------------------------
    mu = jnp.mean(x, axis=-1, keepdims=True)
    var = jnp.mean(jnp.square(x - mu), axis=-1, keepdims=True)
    out_ref[...] = (x - mu) * lax.rsqrt(var + LN_EPS) * g2 + be2


# ------------------------------- packing (init-time only) ---------------------
def pack_params(params):
    """Build the three DMA slabs ONCE at init (hoisted out of the per-call path)."""
    (wq, bq, wk, bk, wv, bv, wo, bo, g1, be1, w1, b1, w2, b2, g2, be2) = params

    w_proj = jnp.concatenate([wq, wk, wv, wo], axis=1)                 # (D, 4D)

    # seg[m, n] = 1 iff m and n belong to the same head (block-diagonal ones).
    seg = jnp.kron(jnp.eye(NHEAD, dtype=jnp.float32), jnp.ones((L, L), jnp.float32))
    w_ffn = jnp.concatenate(
        [w1,
         jnp.pad(w2, ((0, 0), (0, DIM_FF - D))),
         jnp.pad(seg, ((0, 0), (0, DIM_FF - NL)))], axis=0)            # (D+FF+NL, FF)

    head_mask = jnp.kron(jnp.eye(NHEAD, dtype=jnp.float32),
                         jnp.ones((1, HEAD_DIM), jnp.float32))         # (NHEAD, D)

    def row(v):
        v = v.reshape(1, -1).astype(jnp.float32)
        return jnp.pad(v, ((0, 0), (0, DIM_FF - v.shape[1])))

    vec = jnp.concatenate(
        [row(bq), row(bk), row(bv), row(bo), row(b1), row(b2),
         row(g1), row(be1), row(g2), row(be2),
         jnp.pad(head_mask, ((0, 0), (0, DIM_FF - D))),
         jnp.zeros((2, DIM_FF), jnp.float32)], axis=0)                 # (16, FF)
    return w_proj, w_ffn, vec


# ------------------------------- pallas_call -----------------------------------
_COST = pl.CostEstimate(
    flops=2 * ((BS + 2 * BL) * D * 4 * D      # fused QKV(+Wo) projection
               + B * S * NL * D               # scores
               + BS * NL * NL                 # softmax denominators
               + B * S * NL * D               # PV
               + BS * D * D                   # output projection
               + BS * D * DIM_FF + BS * DIM_FF * D),   # FFN
    transcendentals=2 * BS * NL,
    bytes_accessed=4 * ((BS + 2 * BL) * D + BS * NL + D * 4 * D
                        + (D + DIM_FF + NL) * DIM_FF + 16 * DIM_FF + BS * D),
)

_fused_call = pl.pallas_call(
    attention_block_kernel,
    out_shape=jax.ShapeDtypeStruct((BS, D), jnp.float32),
    in_specs=[pl.BlockSpec(memory_space=pltpu.MemorySpace.VMEM)] * 5,
    out_specs=pl.BlockSpec(memory_space=pltpu.MemorySpace.VMEM),
    cost_estimate=_COST,
)


def attention_module_forward(q, k, v, mask, packed):
    """Fused AttentionModule forward (eval mode). Returns (x, None) like the torch module."""
    w_proj, w_ffn, vec = packed
    acts = jnp.concatenate(
        [q.reshape(BS, D), k.reshape(BL, D), v.reshape(BL, D)], axis=0)     # (48, D)
    bias = jnp.where(mask == 0.0, -1e9, 0.0).astype(jnp.float32)            # (B, S, L)
    bias = jnp.tile(bias, (1, 1, NHEAD)).reshape(BS, NL)                    # (BS, NL)
    out = _fused_call(acts, bias, w_proj, w_ffn, vec)
    return out.reshape(B, S, D), None   # ret_att=False


# -------------------------- pure-JAX reference --------------------------------
def reference_forward(q, k, v, mask, params):
    (wq, bq, wk, bk, wv, bv, wo, bo, g1, be1, w1, b1, w2, b2, g2, be2) = params

    def lin(x, w, b):
        return x @ w + b

    def split_heads(x):  # (B, T, D) -> (B, H, T, hd)
        return x.reshape(B, -1, NHEAD, HEAD_DIM).transpose(0, 2, 1, 3)

    Q, K, V = split_heads(lin(q, wq, bq)), split_heads(lin(k, wk, bk)), split_heads(lin(v, wv, bv))
    scores = jnp.einsum("bhsd,bhld->bhsl", Q, K) / math.sqrt(HEAD_DIM)
    scores = jnp.where(mask[:, None, :, :] == 0, -1e9, scores)
    p = jax.nn.softmax(scores, axis=-1)
    attn = jnp.einsum("bhsl,bhld->bhsd", p, V).transpose(0, 2, 1, 3).reshape(B, S, D)
    msa = lin(attn, wo, bo)

    def layernorm(x, g, be):
        mu = x.mean(-1, keepdims=True)
        var = ((x - mu) ** 2).mean(-1, keepdims=True)
        return (x - mu) / jnp.sqrt(var + LN_EPS) * g + be

    x = layernorm(q + msa, g1, be1)
    x = x + lin(jnp.maximum(lin(x, w1, b1), 0.0), w2, b2)
    return layernorm(x, g2, be2)


# --------------------------------- main ----------------------------------------
if __name__ == "__main__":
    key = jax.random.PRNGKey(0)
    keys = jax.random.split(key, 24)

    def dense(kk, fan_in, fan_out):
        # deterministic "Linear"-style init; weight returned pre-transposed (in, out)
        bound = 1.0 / math.sqrt(fan_in)
        w = jax.random.uniform(kk, (fan_in, fan_out), jnp.float32, -bound, bound)
        b = jax.random.uniform(jax.random.fold_in(kk, 1), (1, fan_out), jnp.float32, -bound, bound)
        return w, b

    wq, bq = dense(keys[0], D, D)
    wk, bk = dense(keys[1], D, D)
    wv, bv = dense(keys[2], D, D)
    wo, bo = dense(keys[3], D, D)
    w1, b1 = dense(keys[4], D, DIM_FF)
    w2, b2 = dense(keys[5], DIM_FF, D)
    g1 = jnp.ones((1, D), jnp.float32)
    be1 = jnp.zeros((1, D), jnp.float32)
    g2 = jnp.ones((1, D), jnp.float32)
    be2 = jnp.zeros((1, D), jnp.float32)
    params = (wq, bq, wk, bk, wv, bv, wo, bo, g1, be1, w1, b1, w2, b2, g2, be2)

    # Packing happens ONCE here, not inside the forward path.
    packed = pack_params(params)

    q = jax.random.normal(keys[6], (B, S, D), jnp.float32)
    k = jax.random.normal(keys[7], (B, L, D), jnp.float32)
    v = jax.random.normal(keys[8], (B, L, D), jnp.float32)
    mask = (jax.random.uniform(keys[9], (B, S, L)) > 0.2).astype(jnp.float32)
    mask = mask.at[:, :, 0].set(1.0)  # guarantee at least one unmasked key per query row

    fwd = jax.jit(attention_module_forward)
    out, att = fwd(q, k, v, mask, packed)
    out = jax.block_until_ready(out)

    ref = reference_forward(q, k, v, mask, params)
    assert out.shape == (B, S, D)
    assert att is None
    # tolerance covers pl.reciprocal(approx=True) in the softmax denominator
    assert jnp.allclose(out, ref, atol=2e-3, rtol=2e-3), "mismatch vs pure-JAX reference"

    print("KERNEL_OK")
</pallas_src>

<mosaic_0001>
module attributes {stable_mosaic.version = 11 : i64} {
  func.func @attention_block_kernel(%arg0: memref<48x32xf32, #tpu.memory_space<vmem>>, %arg1: memref<16x32xf32, #tpu.memory_space<vmem>>, %arg2: memref<32x128xf32, #tpu.memory_space<vmem>>, %arg3: memref<128x64xf32, #tpu.memory_space<vmem>>, %arg4: memref<16x64xf32, #tpu.memory_space<vmem>>, %arg5: memref<16x32xf32, #tpu.memory_space<vmem>>) attributes {dimension_semantics = [], scalar_prefetch = 0 : i64, scratch_operands = 0 : i64, tpu.core_type = #tpu.core_type<tc>} {
    %c0 = arith.constant 0 : index
    %c0_0 = arith.constant 0 : index
    %0 = vector.load %arg0[%c0, %c0_0] : memref<48x32xf32, #tpu.memory_space<vmem>>, vector<48x32xf32>
    %1 = vector.extract_strided_slice %0 {offsets = [0, 0], sizes = [16, 32], strides = [1, 1]} : vector<48x32xf32> to vector<16x32xf32>
    %c0_1 = arith.constant 0 : index
    %c0_2 = arith.constant 0 : index
    %2 = vector.load %arg2[%c0_1, %c0_2] : memref<32x128xf32, #tpu.memory_space<vmem>>, vector<32x128xf32>
    %c0_3 = arith.constant 0 : index
    %c0_4 = arith.constant 0 : index
    %3 = vector.load %arg3[%c0_3, %c0_4] : memref<128x64xf32, #tpu.memory_space<vmem>>, vector<128x64xf32>
    %c0_5 = arith.constant 0 : index
    %c0_6 = arith.constant 0 : index
    %4 = vector.load %arg4[%c0_5, %c0_6] : memref<16x64xf32, #tpu.memory_space<vmem>>, vector<16x64xf32>
    %5 = vector.extract_strided_slice %4 {offsets = [0, 0], sizes = [1, 32], strides = [1, 1]} : vector<16x64xf32> to vector<1x32xf32>
    %6 = vector.extract_strided_slice %4 {offsets = [1, 0], sizes = [1, 32], strides = [1, 1]} : vector<16x64xf32> to vector<1x32xf32>
    %7 = vector.extract_strided_slice %4 {offsets = [2, 0], sizes = [1, 32], strides = [1, 1]} : vector<16x64xf32> to vector<1x32xf32>
    %8 = vector.extract_strided_slice %4 {offsets = [3, 0], sizes = [1, 32], strides = [1, 1]} : vector<16x64xf32> to vector<1x32xf32>
    %9 = vector.extract_strided_slice %4 {offsets = [4, 0], sizes = [1, 64], strides = [1, 1]} : vector<16x64xf32> to vector<1x64xf32>
    %10 = vector.extract_strided_slice %4 {offsets = [5, 0], sizes = [1, 32], strides = [1, 1]} : vector<16x64xf32> to vector<1x32xf32>
    %11 = vector.extract_strided_slice %4 {offsets = [6, 0], sizes = [1, 32], strides = [1, 1]} : vector<16x64xf32> to vector<1x32xf32>
    %12 = vector.extract_strided_slice %4 {offsets = [7, 0], sizes = [1, 32], strides = [1, 1]} : vector<16x64xf32> to vector<1x32xf32>
    %13 = vector.extract_strided_slice %4 {offsets = [8, 0], sizes = [1, 32], strides = [1, 1]} : vector<16x64xf32> to vector<1x32xf32>
    %14 = vector.extract_strided_slice %4 {offsets = [9, 0], sizes = [1, 32], strides = [1, 1]} : vector<16x64xf32> to vector<1x32xf32>
    %cst = arith.constant dense<0.000000e+00> : vector<48x128xf32>
    %15 = tpu.matmul %0, %2, %cst {dimension_numbers = #tpu.dot_dimension_numbers<[1], [0], [0], [1], [0, 0, 1, 1], [], []>} : vector<48x32xf32>, vector<32x128xf32>, vector<48x128xf32> -> vector<48x128xf32>
    %16 = vector.extract_strided_slice %15 {offsets = [0, 0], sizes = [16, 32], strides = [1, 1]} : vector<48x128xf32> to vector<16x32xf32>
    %17 = vector.broadcast %5 : vector<1x32xf32> to vector<16x32xf32>
    %18 = arith.addf %16, %17 : vector<16x32xf32>
    %19 = vector.extract_strided_slice %15 {offsets = [16, 32], sizes = [16, 32], strides = [1, 1]} : vector<48x128xf32> to vector<16x32xf32>
    %20 = vector.broadcast %6 : vector<1x32xf32> to vector<16x32xf32>
    %21 = arith.addf %19, %20 : vector<16x32xf32>
    %22 = vector.extract_strided_slice %15 {offsets = [32, 64], sizes = [16, 32], strides = [1, 1]} : vector<48x128xf32> to vector<16x32xf32>
    %23 = vector.broadcast %7 : vector<1x32xf32> to vector<16x32xf32>
    %24 = arith.addf %22, %23 : vector<16x32xf32>
    %25 = vector.shape_cast %18 : vector<16x32xf32> to vector<2x8x32xf32>
    %26 = vector.shape_cast %21 : vector<16x32xf32> to vector<2x8x32xf32>
    %27 = vector.shape_cast %24 : vector<16x32xf32> to vector<2x8x32xf32>
    %28 = vector.extract_strided_slice %4 {offsets = [10, 0], sizes = [1, 32], strides = [1, 1]} : vector<16x64xf32> to vector<1x32xf32>
    %29 = vector.shape_cast %28 : vector<1x32xf32> to vector<1x1x32xf32>
    %30 = vector.broadcast %29 : vector<1x1x32xf32> to vector<2x8x32xf32>
    %31 = arith.mulf %26, %30 : vector<2x8x32xf32>
    %32 = vector.extract_strided_slice %4 {offsets = [11, 0], sizes = [1, 32], strides = [1, 1]} : vector<16x64xf32> to vector<1x32xf32>
    %33 = vector.shape_cast %32 : vector<1x32xf32> to vector<1x1x32xf32>
    %34 = vector.broadcast %33 : vector<1x1x32xf32> to vector<2x8x32xf32>
    %35 = arith.mulf %26, %34 : vector<2x8x32xf32>
    %36 = vector.extract_strided_slice %4 {offsets = [12, 0], sizes = [1, 32], strides = [1, 1]} : vector<16x64xf32> to vector<1x32xf32>
    %37 = vector.shape_cast %36 : vector<1x32xf32> to vector<1x1x32xf32>
    %38 = vector.broadcast %37 : vector<1x1x32xf32> to vector<2x8x32xf32>
    %39 = arith.mulf %26, %38 : vector<2x8x32xf32>
    %40 = vector.extract_strided_slice %4 {offsets = [13, 0], sizes = [1, 32], strides = [1, 1]} : vector<16x64xf32> to vector<1x32xf32>
    %41 = vector.shape_cast %40 : vector<1x32xf32> to vector<1x1x32xf32>
    %42 = vector.broadcast %41 : vector<1x1x32xf32> to vector<2x8x32xf32>
    %43 = arith.mulf %26, %42 : vector<2x8x32xf32>
    %44 = tpu.concatenate %31, %35, %39, %43 in 1 : vector<2x8x32xf32>, vector<2x8x32xf32>, vector<2x8x32xf32>, vector<2x8x32xf32> -> vector<2x32x32xf32>
    %45 = vector.extract_strided_slice %4 {offsets = [10, 0], sizes = [1, 32], strides = [1, 1]} : vector<16x64xf32> to vector<1x32xf32>
    %46 = vector.shape_cast %45 : vector<1x32xf32> to vector<1x1x32xf32>
    %47 = vector.broadcast %46 : vector<1x1x32xf32> to vector<2x8x32xf32>
    %48 = arith.mulf %27, %47 : vector<2x8x32xf32>
    %49 = vector.extract_strided_slice %4 {offsets = [11, 0], sizes = [1, 32], strides = [1, 1]} : vector<16x64xf32> to vector<1x32xf32>
    %50 = vector.shape_cast %49 : vector<1x32xf32> to vector<1x1x32xf32>
    %51 = vector.broadcast %50 : vector<1x1x32xf32> to vector<2x8x32xf32>
    %52 = arith.mulf %27, %51 : vector<2x8x32xf32>
    %53 = vector.extract_strided_slice %4 {offsets = [12, 0], sizes = [1, 32], strides = [1, 1]} : vector<16x64xf32> to vector<1x32xf32>
    %54 = vector.shape_cast %53 : vector<1x32xf32> to vector<1x1x32xf32>
    %55 = vector.broadcast %54 : vector<1x1x32xf32> to vector<2x8x32xf32>
    %56 = arith.mulf %27, %55 : vector<2x8x32xf32>
    %57 = vector.extract_strided_slice %4 {offsets = [13, 0], sizes = [1, 32], strides = [1, 1]} : vector<16x64xf32> to vector<1x32xf32>
    %58 = vector.shape_cast %57 : vector<1x32xf32> to vector<1x1x32xf32>
    %59 = vector.broadcast %58 : vector<1x1x32xf32> to vector<2x8x32xf32>
    %60 = arith.mulf %27, %59 : vector<2x8x32xf32>
    %61 = tpu.concatenate %48, %52, %56, %60 in 1 : vector<2x8x32xf32>, vector<2x8x32xf32>, vector<2x8x32xf32>, vector<2x8x32xf32> -> vector<2x32x32xf32>
    "tpu.trace_start"() <{level = 10 : i32, message = "bqd,bnd->bqn"}> : () -> ()
    %cst_7 = arith.constant dense<0.000000e+00> : vector<2x8x32xf32>
    %62 = tpu.matmul %25, %44, %cst_7 {dimension_numbers = #tpu.dot_dimension_numbers<[2], [2], [1], [1], [0, 0, 0, 1, 1, 1], [0], [0]>} : vector<2x8x32xf32>, vector<2x32x32xf32>, vector<2x8x32xf32> -> vector<2x8x32xf32>
    "tpu.trace_stop"() : () -> ()
    %63 = vector.shape_cast %62 : vector<2x8x32xf32> to vector<16x32xf32>
    %cst_8 = arith.constant 0.353553385 : f32
    %64 = vector.broadcast %cst_8 : f32 to vector<16x32xf32>
    %65 = arith.mulf %63, %64 : vector<16x32xf32>
    %c0_9 = arith.constant 0 : index
    %c0_10 = arith.constant 0 : index
    %66 = vector.load %arg1[%c0_9, %c0_10] : memref<16x32xf32, #tpu.memory_space<vmem>>, vector<16x32xf32>
    %67 = arith.addf %65, %66 : vector<16x32xf32>
    %cst_11 = arith.constant dense<0xFF800000> : vector<16xf32>
    %68 = vector.multi_reduction <maximumf>, %67, %cst_11 [1] : vector<16x32xf32> to vector<16xf32>
    %69 = vector.shape_cast %68 : vector<16xf32> to vector<16x1xf32>
    %70 = vector.broadcast %69 : vector<16x1xf32> to vector<16x32xf32>
    %71 = arith.subf %67, %70 : vector<16x32xf32>
    %72 = math.exp %71 : vector<16x32xf32>
    %73 = vector.extract_strided_slice %3 {offsets = [96, 0], sizes = [32, 32], strides = [1, 1]} : vector<128x64xf32> to vector<32x32xf32>
    %cst_12 = arith.constant dense<0.000000e+00> : vector<16x32xf32>
    %74 = tpu.matmul %72, %73, %cst_12 {dimension_numbers = #tpu.dot_dimension_numbers<[1], [0], [0], [1], [0, 0, 1, 1], [], []>} : vector<16x32xf32>, vector<32x32xf32>, vector<16x32xf32> -> vector<16x32xf32>
    %75 = tpu.reciprocal %74 {approx = true} : vector<16x32xf32> -> vector<16x32xf32>
    %76 = arith.mulf %72, %75 : vector<16x32xf32>
    %77 = vector.shape_cast %76 : vector<16x32xf32> to vector<2x8x32xf32>
    "tpu.trace_start"() <{level = 10 : i32, message = "bqn,bnd->bqd"}> : () -> ()
    %cst_13 = arith.constant dense<0.000000e+00> : vector<2x8x32xf32>
    %78 = tpu.matmul %77, %61, %cst_13 {dimension_numbers = #tpu.dot_dimension_numbers<[2], [1], [1], [2], [0, 0, 0, 1, 1, 2], [0], [0]>} : vector<2x8x32xf32>, vector<2x32x32xf32>, vector<2x8x32xf32> -> vector<2x8x32xf32>
    "tpu.trace_stop"() : () -> ()
    %79 = vector.shape_cast %78 : vector<2x8x32xf32> to vector<16x32xf32>
    %80 = vector.extract_strided_slice %2 {offsets = [0, 96], sizes = [32, 32], strides = [1, 1]} : vector<32x128xf32> to vector<32x32xf32>
    %cst_14 = arith.constant dense<0.000000e+00> : vector<16x32xf32>
    %81 = tpu.matmul %79, %80, %cst_14 {dimension_numbers = #tpu.dot_dimension_numbers<[1], [0], [0], [1], [0, 0, 1, 1], [], []>} : vector<16x32xf32>, vector<32x32xf32>, vector<16x32xf32> -> vector<16x32xf32>
    %82 = vector.broadcast %8 : vector<1x32xf32> to vector<16x32xf32>
    %83 = arith.addf %81, %82 : vector<16x32xf32>
    %84 = arith.addf %1, %83 : vector<16x32xf32>
    %cst_15 = arith.constant dense<0.000000e+00> : vector<16xf32>
    %85 = vector.multi_reduction <add>, %84, %cst_15 [1] : vector<16x32xf32> to vector<16xf32>
    %86 = vector.shape_cast %85 : vector<16xf32> to vector<16x1xf32>
    %cst_16 = arith.constant 3.200000e+01 : f32
    %87 = vector.broadcast %cst_16 : f32 to vector<16x1xf32>
    %88 = arith.divf %86, %87 : vector<16x1xf32>
    %89 = vector.broadcast %88 : vector<16x1xf32> to vector<16x32xf32>
    %90 = arith.subf %84, %89 : vector<16x32xf32>
    %91 = arith.mulf %90, %90 : vector<16x32xf32>
    %cst_17 = arith.constant dense<0.000000e+00> : vector<16xf32>
    %92 = vector.multi_reduction <add>, %91, %cst_17 [1] : vector<16x32xf32> to vector<16xf32>
    %93 = vector.shape_cast %92 : vector<16xf32> to vector<16x1xf32>
    %cst_18 = arith.constant 3.200000e+01 : f32
    %94 = vector.broadcast %cst_18 : f32 to vector<16x1xf32>
    %95 = arith.divf %93, %94 : vector<16x1xf32>
    %96 = vector.broadcast %88 : vector<16x1xf32> to vector<16x32xf32>
    %97 = arith.subf %84, %96 : vector<16x32xf32>
    %cst_19 = arith.constant 9.99999974E-6 : f32
    %98 = vector.broadcast %cst_19 : f32 to vector<16x1xf32>
    %99 = arith.addf %95, %98 : vector<16x1xf32>
    %100 = math.rsqrt %99 : vector<16x1xf32>
    %101 = vector.broadcast %100 : vector<16x1xf32> to vector<16x32xf32>
    %102 = arith.mulf %97, %101 : vector<16x32xf32>
    %103 = vector.broadcast %11 : vector<1x32xf32> to vector<16x32xf32>
    %104 = arith.mulf %102, %103 : vector<16x32xf32>
    %105 = vector.broadcast %12 : vector<1x32xf32> to vector<16x32xf32>
    %106 = arith.addf %104, %105 : vector<16x32xf32>
    %107 = vector.extract_strided_slice %3 {offsets = [0, 0], sizes = [32, 64], strides = [1, 1]} : vector<128x64xf32> to vector<32x64xf32>
    %108 = vector.extract_strided_slice %3 {offsets = [32, 0], sizes = [64, 32], strides = [1, 1]} : vector<128x64xf32> to vector<64x32xf32>
    %cst_20 = arith.constant dense<0.000000e+00> : vector<16x64xf32>
    %109 = tpu.matmul %106, %107, %cst_20 {dimension_numbers = #tpu.dot_dimension_numbers<[1], [0], [0], [1], [0, 0, 1, 1], [], []>} : vector<16x32xf32>, vector<32x64xf32>, vector<16x64xf32> -> vector<16x64xf32>
    %110 = vector.broadcast %9 : vector<1x64xf32> to vector<16x64xf32>
    %111 = arith.addf %109, %110 : vector<16x64xf32>
    %cst_21 = arith.constant 0.000000e+00 : f32
    %112 = vector.broadcast %cst_21 : f32 to vector<16x64xf32>
    %113 = arith.maximumf %111, %112 : vector<16x64xf32>
    %cst_22 = arith.constant dense<0.000000e+00> : vector<16x32xf32>
    %114 = tpu.matmul %113, %108, %cst_22 {dimension_numbers = #tpu.dot_dimension_numbers<[1], [0], [0], [1], [0, 0, 1, 1], [], []>} : vector<16x64xf32>, vector<64x32xf32>, vector<16x32xf32> -> vector<16x32xf32>
    %115 = arith.addf %106, %114 : vector<16x32xf32>
    %116 = vector.broadcast %10 : vector<1x32xf32> to vector<16x32xf32>
    %117 = arith.addf %115, %116 : vector<16x32xf32>
    %cst_23 = arith.constant dense<0.000000e+00> : vector<16xf32>
    %118 = vector.multi_reduction <add>, %117, %cst_23 [1] : vector<16x32xf32> to vector<16xf32>
    %119 = vector.shape_cast %118 : vector<16xf32> to vector<16x1xf32>
    %cst_24 = arith.constant 3.200000e+01 : f32
    %120 = vector.broadcast %cst_24 : f32 to vector<16x1xf32>
    %121 = arith.divf %119, %120 : vector<16x1xf32>
    %122 = vector.broadcast %121 : vector<16x1xf32> to vector<16x32xf32>
    %123 = arith.subf %117, %122 : vector<16x32xf32>
    %124 = arith.mulf %123, %123 : vector<16x32xf32>
    %cst_25 = arith.constant dense<0.000000e+00> : vector<16xf32>
    %125 = vector.multi_reduction <add>, %124, %cst_25 [1] : vector<16x32xf32> to vector<16xf32>
    %126 = vector.shape_cast %125 : vector<16xf32> to vector<16x1xf32>
    %cst_26 = arith.constant 3.200000e+01 : f32
    %127 = vector.broadcast %cst_26 : f32 to vector<16x1xf32>
    %128 = arith.divf %126, %127 : vector<16x1xf32>
    %129 = vector.broadcast %121 : vector<16x1xf32> to vector<16x32xf32>
    %130 = arith.subf %117, %129 : vector<16x32xf32>
    %cst_27 = arith.constant 9.99999974E-6 : f32
    %131 = vector.broadcast %cst_27 : f32 to vector<16x1xf32>
    %132 = arith.addf %128, %131 : vector<16x1xf32>
    %133 = math.rsqrt %132 : vector<16x1xf32>
    %134 = vector.broadcast %133 : vector<16x1xf32> to vector<16x32xf32>
    %135 = arith.mulf %130, %134 : vector<16x32xf32>
    %136 = vector.broadcast %13 : vector<1x32xf32> to vector<16x32xf32>
    %137 = arith.mulf %135, %136 : vector<16x32xf32>
    %138 = vector.broadcast %14 : vector<1x32xf32> to vector<16x32xf32>
    %139 = arith.addf %137, %138 : vector<16x32xf32>
    %c0_28 = arith.constant 0 : index
    %c0_29 = arith.constant 0 : index
    %140 = vector.load %arg5[%c0_28, %c0_29] : memref<16x32xf32, #tpu.memory_space<vmem>>, vector<16x32xf32>
    tpu.vector_store %arg5[%c0_28, %c0_29], %139 {strides = array<i32>} : memref<16x32xf32, #tpu.memory_space<vmem>>, vector<16x32xf32>,
    return
  }
}

</mosaic_0001>

<bundles_post_ra>
// kernel: tile.9
= control target key start
LH: loop header
LB: loop body
LE: loop exit
PB: predicated region body
PF: predicated region fallthrough
CT: control target
= control target key end

     0   :  { %vm82_vm0 = vcmask 1047556   ;;  %vm84_vm1 = vcmask 64512   ;;  %s195_s9 = smov 24   ;;  %s196_s14 = smov 8   ;;  %vm103_vm2 = vcmask 261312   ;;  %vm124_vm3 = vcmask 195712   ;;  %s289_s0 = inlined_call_operand.vmem [shape: f32[2,1,8,4,8], index: 0, kind: input, shape index: {}]   ;;  %s290_s1 = inlined_call_operand.vmem [shape: f32[16,32], index: 1, kind: output, shape index: {}]  }
   0x1   :  { %v180_v0 = vld [vmem:[%s289_s0 + $0x1c] sm:$0xf]  ;;  %v181_v1 = vld [vmem:[%s289_s0 + $0x18] sm:$0xf]  ;;  %v182_v2 = vld [vmem:[%s289_s0 + $0x14] sm:$0xf] }
   0x2   :  { %48 = vst [vmem:[#allocation0 + $0x38] sm:$0xf] %v180_v0  ;;  %53 = vst [vmem:[#allocation0 + $0x30] sm:$0xf] %v181_v1  ;;  %v183_v3 = vld [vmem:[%s289_s0 + $0x10] sm:$0xf] }
   0x3   :  { %58 = vst [vmem:[#allocation0 + $0x28] sm:$0xf] %v182_v2  ;;  %v184_v4 = vld [vmem:[%s289_s0 + $0xc] sm:$0xf]  ;;  %v185_v5 = vld [vmem:[%s289_s0 + $0x8] sm:$0xf] }
   0x4   :  { %63 = vst [vmem:[#allocation0 + $0x20] sm:$0xf] %v183_v3  ;;  %68 = vst [vmem:[#allocation0 + $0x18] sm:$0xf] %v184_v4  ;;  %v186_v6 = vld [vmem:[%s289_s0 + $0x4] sm:$0xf] }
   0x5   :  { %73 = vst [vmem:[#allocation0 + $0x10] sm:$0xf] %v185_v5  ;;  %v78_v7 = vld [vmem:[%s289_s0] sm:$0xf]  ;;  %77 = vst [vmem:[#allocation0 + $0x8] sm:$0xf] %v186_v6 }
   0x6   :  { %79 = vst [vmem:[#allocation0] sm:$0xf] %v78_v7  ;;  %v172_v8 = vld [vmem:[%s289_s0 + $0x3c] sm:$0xf]  ;;  %v173_v9 = vld [vmem:[%s289_s0 + $0x38] sm:$0xf] }
   0x7   :  { %8 = vst [vmem:[#allocation0 + $0x78] sm:$0xf] %v172_v8  ;;  %13 = vst [vmem:[#allocation0 + $0x70] sm:$0xf] %v173_v9  ;;  %v174_v10 = vld [vmem:[%s289_s0 + $0x34] sm:$0xf] }
   0x8   :  { %v175_v11 = vld [vmem:[%s289_s0 + $0x30] sm:$0xf]  ;;  %v176_v12 = vld [vmem:[%s289_s0 + $0x2c] sm:$0xf]  ;;  %18 = vst [vmem:[#allocation0 + $0x68] sm:$0xf] %v174_v10 }
   0x9   :  { %23 = vst [vmem:[#allocation0 + $0x60] sm:$0xf] %v175_v11  ;;  %28 = vst [vmem:[#allocation0 + $0x58] sm:$0xf] %v176_v12  ;;  %v177_v13 = vld [vmem:[%s289_s0 + $0x28] sm:$0xf] }
   0xa   :  { %v178_v14 = vld [vmem:[%s289_s0 + $0x24] sm:$0xf]  ;;  %v179_v15 = vld [vmem:[%s289_s0 + $0x20] sm:$0xf]  ;;  %33 = vst [vmem:[#allocation0 + $0x50] sm:$0xf] %v177_v13 }
   0xb   :  { %38 = vst [vmem:[#allocation0 + $0x48] sm:$0xf] %v178_v14  ;;  %43 = vst [vmem:[#allocation0 + $0x40] sm:$0xf] %v179_v15  ;;  %s194_s0 = smov 16   ;;  %vm145_vm4 = vcmask 130112  }
   0xc   :  { %v119_v16 = vld [vmem:[#allocation0 + $0x2] ss:$8 sm:$0xf0]   ;;  %v98_v17 = vld [vmem:[#allocation0 + $0x3] ss:$8 sm:$0xf0]  }
   0xd   :  { %v117_v18 = vld [vmem:[#allocation0 + $0x2] ss:$8 sm:$0xf]   ;;  %v96_v19 = vld [vmem:[#allocation0 + $0x3] ss:$8 sm:$0xf]  }
   0xe   :  { %v121_v20 = vsel %vm82_vm0, %v119_v16, %v117_v18  ;;  %v100_v21 = vsel %vm82_vm0, %v98_v17, %v96_v19  ;;  %v138_v24 = vld [vmem:[#allocation0 + $0x1] ss:$8 sm:$0xf]   ;;  %v80_v32 = vld [vmem:[#allocation0] ss:$8 sm:$0xf]  }
   0xf   :  { %122 = vrot.lane.b32.xlu1 %v121_v20, %s194_s0  ;;  %101 = vrot.lane.b32.xlu0 %v100_v21, %s195_s9  ;;  %v140_v25 = vld [vmem:[#allocation0 + $0x1] ss:$8 sm:$0xf0]   ;;  %v81_v33 = vld [vmem:[#allocation0] ss:$8 sm:$0xf0]  }
  0x10   :  { %v129_v22 = vld [vmem:[#allocation0 + $0x42] ss:$8 sm:$0xf0]   ;;  %v108_v23 = vld [vmem:[#allocation0 + $0x43] ss:$8 sm:$0xf0]   ;;  %v83_v34 = vsel %vm82_vm0, %v81_v33, %v80_v32  ;;  %v142_v38 = vsel %vm82_vm0, %v140_v25, %v138_v24 }
  0x11   :  { %v150_v31 = vld [vmem:[#allocation0 + $0x41] ss:$8 sm:$0xf0]   ;;  %v89_v36 = vld [vmem:[#allocation0 + $0x40] ss:$8 sm:$0xf0]  }
  0x12   :  { %v127_v26 = vld [vmem:[#allocation0 + $0x42] ss:$8 sm:$0xf]   ;;  %v106_v27 = vld [vmem:[#allocation0 + $0x43] ss:$8 sm:$0xf]  }
  0x13   :  { %v131_v28 = vsel %vm82_vm0, %v129_v22, %v127_v26  ;;  %v110_v29 = vsel %vm82_vm0, %v108_v23, %v106_v27  ;;  %v148_v30 = vld [vmem:[#allocation0 + $0x41] ss:$8 sm:$0xf]   ;;  %v87_v35 = vld [vmem:[#allocation0 + $0x40] ss:$8 sm:$0xf]  }
  0x14   :  { %132 = vrot.lane.b32.xlu1 %v131_v28, %s194_s0  ;;  %111 = vrot.lane.b32.xlu0 %v110_v29, %s195_s9  ;;  %v152_v37 = vsel %vm82_vm0, %v150_v31, %v148_v30  ;;  %85 = vst.msk [vmem:[%s290_s1] sm:$0xff] %vm84_vm1, %v83_v34   ;;  %v91_v39 = vsel %vm82_vm0, %v89_v36, %v87_v35 }
  0x15   :  { %187 = vst.msk [vmem:[%s290_s1 + $0x8] sm:$0xff] %vm84_vm1, %v91_v39  }
  0x18   :  { %153 = vrot.lane.b32.xlu1 %v152_v37, %s196_s14  ;;  %143 = vrot.lane.b32.xlu0 %v142_v38, %s196_s14 }
  0x81   :  { %v123_v40 = vpop.permute.xlu1 %122   ;;  %v102_v41 = vpop.permute.xlu0 %101  }
  0x82   :  { %104 = vst.msk [vmem:[%s290_s1] sm:$0xff] %vm103_vm2, %v102_v41  }
  0x83   :  { %125 = vst.msk [vmem:[%s290_s1] sm:$0xff] %vm124_vm3, %v123_v40  }
  0x86   :  { %v133_v42 = vpop.permute.xlu1 %132   ;;  %v112_v43 = vpop.permute.xlu0 %111  }
  0x87   :  { %188 = vst.msk [vmem:[%s290_s1 + $0x8] sm:$0xff] %vm103_vm2, %v112_v43  }
  0x88   :  { %189 = vst.msk [vmem:[%s290_s1 + $0x8] sm:$0xff] %vm124_vm3, %v133_v42  }
  0x8a   :  { %v154_v44 = vpop.permute.xlu1 %153   ;;  %v144_v45 = vpop.permute.xlu0 %143  }
  0x8b   :  { %190 = vst.msk [vmem:[%s290_s1 + $0x8] sm:$0xff] %vm145_vm4, %v154_v44   ;;  %146 = vst.msk [vmem:[%s290_s1] sm:$0xff] %vm145_vm4, %v144_v45  }

// kernel: attention_module_forward.1
= control target key start
LH: loop header
LB: loop body
LE: loop exit
PB: predicated region body
PF: predicated region fallthrough
CT: control target
= control target key end

     0   :  { %vm49_vm0 = vcmask 261120   ;;  %v163_v3 = vlaneseq  ;;  %s1776_s0 = inlined_call_operand.vmem [shape: f32[48,32], index: 0, kind: input, shape index: {}]   ;;  %s1777_s1 = inlined_call_operand.vmem [shape: f32[16,32], index: 1, kind: input, shape index: {}]   ;;  %s1778_s2 = inlined_call_operand.vmem [shape: f32[32,128], index: 2, kind: input, shape index: {}]   ;;  %s1779_s3 = inlined_call_operand.vmem [shape: f32[128,64], index: 3, kind: input, shape index: {}]   ;;  %s1780_s4 = inlined_call_operand.vmem [shape: f32[16,64], index: 4, kind: input, shape index: {}]   ;;  %s1781_s5 = inlined_call_operand.hbm [shape: f32[16,32], index: 5, kind: output, shape index: {}]  }
   0x1   :  { %v1505_v0 = vld [vmem:[%s1778_s2] sm:$0xff]  ;;  %v1510_v1 = vld [vmem:[%s1778_s2 + $0x8] sm:$0xff]  ;;  %v1515_v2 = vld [vmem:[%s1778_s2 + $0x10] sm:$0xff] }
   0x2   :  { %v1413_v4 = vpack.i.bf16 %v1510_v1, %v1505_v0  ;;  %v1288_v5 = vpack.c.bf16 %v1510_v1, %v1505_v0  ;;  %v1524_v6 = vld [vmem:[%s1778_s2 + $0x18] sm:$0xff]  ;;  %v1529_v7 = vld [vmem:[%s1776_s0] sm:$0xff]  ;;  %v1535_v9 = vshrl.u32 %v163_v3, 7  ;;  %v1545_v11 = vld [vmem:[%s1780_s4 + $0x8] sm:$0xff] }
   0x3   :  { %v1292_v8 = vpack.c.bf16 %v1524_v6, %v1515_v2  ;;  %1183 = vmatprep.mubr.msk.f32.mxu1 %vm49_vm0, %v1529_v7  ;;  %v1540_v10 = vld [vmem:[%s1780_s4] sm:$0xff] }
   0x4   :  { %1289 = vmatprep.subr.bf16.mxu1 %v1288_v5 }
   0x5   :  { %10 = vsyncpa [#allocation3], 0  ;;  %1291 = vmatpush3.bf16.msra.mxu1 %v1288_v5  ;;  %v171_v12 = vsub.s32 1, %v1535_v9  ;;  %v201_v13 = vsub.s32 3, %v1535_v9  ;;  %v181_v14 = vsub.s32 2, %v1535_v9  ;;  %v211_v15 = vsub.s32 4, %v1535_v9 }
   0x6   :  { %1293 = vmatprep.subr.bf16.mxu1 %v1292_v8  ;;  %v1562_v18 = vld [vmem:[%s1776_s0 + $0x8] sm:$0xff]  ;;  %s1463_s7 = smov 32   ;;  %v221_v20 = vsub.s32 5, %v1535_v9  ;;  %v23_v21 = vld [vmem:[%s1776_s0 + $0x10] sm:$0xff]  ;;  %v24_v23 = vld [vmem:[%s1776_s0 + $0x18] sm:$0xff]  ;;  %v1464_v30 = vmov 0.0|0.0  }
   0x7   :  { %v172_v16 = vrot.slane %v1540_v10, %v171_v12  ;;  %v1557_v17 = vrot.slane %v1545_v11, %v201_v13  ;;  %v1568_v19 = vrot.slane %v1545_v11, %v181_v14  ;;  %v1579_v22 = vrot.slane %v1545_v11, %v211_v15  ;;  %1304 = vmatprep.subr.bf16.mxu0 %v1464_v30  ;;  %s1465_s12 = smov 96   ;;  %v25_v47 = vld [vmem:[%s1776_s0 + $0x20] sm:$0xff]  ;;  %v26_v48 = vld [vmem:[%s1776_s0 + $0x28] sm:$0xff]  ;;  %vm1617_vm2 = vmpackc.low %vm49_vm0, %vm49_vm0  ;;  %s1468_s20 = smov 64  }
   0x8   :  { %v1592_v24 = vrot.slane %v1545_v11, %v221_v20  ;;  %vm1466_vm1 = vmmov 0   ;;  %v1467_v50 = vmov 0.0   ;;  %vm945_vm3 = vcmask 523264  }
   0x9   :  { %1295 = vmatpush3.bf16.msra.mxu1 %v1292_v8  ;;  %174 = vrot.lane.b32.xlu0 %v172_v16, %s1463_s7  ;;  %v165_v16 = vsub.s32 0, %v1535_v9 }
   0xa   :  { %204 = vrot.lane.b32.xlu1 %v1557_v17, %s1463_s7  ;;  %1296 = vmatprep.subr.bf16.mxu1 %v1464_v30 }
   0xb   :  { %1211 = vmatprep.mubr.msk.f32.mxu0 %vm1466_vm1, %v1467_v50 }
   0xc   :  { %1184 = vmatmul.mubr.msk.f32.vlgmr.msra.gmra.mrb[0].mxu1 %vm49_vm0, %v1562_v18 }
   0xd   :  { %1186 = vmatprep.mubr.msk.f32.mxu1 %vm49_vm0, %v23_v21  ;;  %194 = vrot.lane.b32.xlu0 %v1568_v19, %s1463_s7 }
   0xe   :  { %214 = vrot.lane.b32.xlu1 %v1579_v22, %s1463_s7 }
  0x10   :  { %1187 = vmatmul.mubr.msk.f32.gmra.mrb[2].mxu1 %vm49_vm0, %v24_v23 }
  0x11   :  { %224 = vrot.lane.b32.xlu0 %v1592_v24, %s1463_s7  ;;  %1189 = vmatprep.mubr.msk.f32.mxu1 %vm49_vm0, %v25_v47 }
  0x14   :  { %1190 = vmatmul.mubr.msk.f32.gmra.mrb[4].mxu1 %vm49_vm0, %v26_v48 }
  0x15   :  { %1200 = vmatprep.mubr.msk.f32.mxu1 %vm1466_vm1, %v1467_v50 }
  0x7b   :  { %v175_v25 = vpop.permute.xlu0 %174 }
  0x7c   :  { %v205_v26 = vpop.permute.xlu1 %204 }
  0x7f   :  { %v195_v28 = vpop.permute.xlu0 %194 }
  0x80   :  { %v215_v35 = vpop.permute.xlu1 %214 }
  0x83   :  { %v225_v36 = vpop.permute.xlu0 %224 }
  0xdf   :  { %v1599_v27 = vpop.f32.mrb[0].mxu1 }
  0xe0   :  { %v134_v29 = vpop.f32.mrb[1].mxu1 }
  0xe3   :  { %v1188_v31 = vpop.f32.mrb[2].mxu1 }
  0xe4   :  { %v178_v32 = vadd.f32 %v1188_v31, %v175_v25  ;;  %v144_v33 = vpop.f32.mrb[3].mxu1 }
  0xe5   :  { %v177_v34 = vadd.f32 %v175_v25, %v144_v33  ;;  %v166_v25 = vrot.slane %v1540_v10, %v165_v16 }
  0xe6   :  { %v198_v37 = vmul.f32 %v195_v28, %v178_v32  ;;  %v208_v38 = vmul.f32 %v205_v26, %v178_v32  ;;  %v218_v41 = vmul.f32 %v215_v35, %v178_v32  ;;  %v228_v42 = vmul.f32 %v225_v36, %v178_v32 }
  0xe7   :  { %v197_v39 = vmul.f32 %v195_v28, %v177_v34  ;;  %v207_v40 = vmul.f32 %v205_v26, %v177_v34  ;;  %v217_v44 = vmul.f32 %v215_v35, %v177_v34  ;;  %v227_v45 = vmul.f32 %v225_v36, %v177_v34  ;;  %v1191_v31 = vpop.f32.mrb[4].mxu1  ;;  %v438_v34 = vld [vmem:[%s1777_s1 + $0x8] sm:$0xff] }
  0xe8   :  { %v1378_v43 = vpack.i.bf16 %v208_v38, %v198_v37  ;;  %v1388_v49 = vpack.i.bf16 %v228_v42, %v218_v41  ;;  %v168_v26 = vadd.f32 %v1599_v27, %v166_v25  ;;  %v167_v28 = vadd.f32 %v166_v25, %v134_v29  ;;  %v154_v32 = vpop.f32.mrb[5].mxu1  ;;  %v437_v27 = vld [vmem:[%s1777_s1] sm:$0xff] }
  0xe9   :  { %v1373_v46 = vpack.i.bf16 %v207_v40, %v197_v39  ;;  %v1383_v51 = vpack.i.bf16 %v227_v45, %v217_v44  ;;  %v43_v44 = vld [vmem:[%s1779_s3 + $0x60] sm:$0xff]  ;;  %v44_v45 = vld [vmem:[%s1779_s3 + $0x68] sm:$0xff] }
  0xea   :  { %1379 = vrot.lane.b32.xlu0 %v1378_v43, %s1465_s12  ;;  %v182_v43 = vrot.slane %v1540_v10, %v181_v14  ;;  %v45_v14 = vld [vmem:[%s1779_s3 + $0x70] sm:$0xff] }
  0xeb   :  { %1374 = vrot.lane.b32.xlu1 %v1373_v46, %s1465_s12  ;;  %v1312_v46 = vpack.c.bf16 %v44_v45, %v43_v44 }
  0xee   :  { %1389 = vrot.lane.b32.xlu0 %v1388_v49, %s1465_s12 }
  0xef   :  { %1384 = vrot.lane.b32.xlu1 %v1383_v51, %s1465_s12 }
 0x15c   :  { %v1380_v52 = vpop.permute.xlu0 %1379 }
 0x15d   :  { %v1382_v53 = vunpack.i.h.bf16 %v1380_v52  ;;  %v1381_v54 = vunpack.i.l.bf16 %v1380_v52  ;;  %v1375_v55 = vpop.permute.xlu1 %1374 }
 0x15e   :  { %v1377_v56 = vunpack.i.h.bf16 %v1375_v55  ;;  %v1376_v57 = vunpack.i.l.bf16 %v1375_v55 }
 0x15f   :  { %v1305_v59 = vpack.c.bf16 %v1382_v53, %v1381_v54 }
 0x160   :  { %v1297_v60 = vpack.c.bf16 %v1377_v56, %v1376_v57  ;;  %v1390_v61 = vpop.permute.xlu0 %1389 }
 0x161   :  { %1307 = vmatpush3.bf16.xpose.msk.msra.mxu0 %vm1617_vm2, %v1305_v59  ;;  %v1385_v62 = vpop.permute.xlu1 %1384  ;;  %v1392_v63 = vunpack.i.h.bf16 %v1390_v61  ;;  %v1391_v3 = vunpack.i.l.bf16 %v1390_v61 }
 0x162   :  { %1299 = vmatpush3.bf16.xpose.msk.msra.mxu1 %vm1617_vm2, %v1297_v60  ;;  %1308 = vmatprep.subr.bf16.mxu0 %v1464_v30  ;;  %v1387_v5 = vunpack.i.h.bf16 %v1385_v62  ;;  %v1386_v8 = vunpack.i.l.bf16 %v1385_v62 }
 0x163   :  { %1300 = vmatprep.subr.bf16.mxu1 %v1464_v30  ;;  %v1309_v21 = vpack.c.bf16 %v1392_v63, %v1391_v3 }
 0x164   :  { %v1301_v23 = vpack.c.bf16 %v1387_v5, %v1386_v8 }
 0x169   :  { %1311 = vmatpush3.bf16.xpose.msk.msra.mxu0 %vm1617_vm2, %v1309_v21 }
 0x16a   :  { %1303 = vmatpush3.bf16.xpose.msk.msra.mxu1 %vm1617_vm2, %v1301_v23  ;;  %1320 = vmatprep.subr.bf16.mxu0 %v1464_v30 }
 0x16b   :  { %1313 = vmatprep.subr.bf16.mxu1 %v1312_v46 }
 0x170   :  { %1212 = vmatmul.mubr.msk.f32.vlgmr.msra.gmra.mrb[0].mxu0 %vm49_vm0, %v168_v26 }
 0x171   :  { %1201 = vmatmul.mubr.msk.f32.vlgmr.msra.gmra.mrb[6].mxu1 %vm49_vm0, %v167_v28  ;;  %1233 = vmatprep.mubr.msk.f32.mxu0 %vm1466_vm1, %v1467_v50 }
 0x172   :  { %1315 = vmatpush3.bf16.msra.mxu1 %v1312_v46 }
 0x243   :  { %v431_v33 = vpop.f32.mrb[0].mxu0 }
 0x244   :  { %v436_v35 = vmul.f32 0.35355338, %v431_v33  ;;  %v338_v36 = vpop.f32.mrb[6].mxu1  ;;  %v1213_v37 = vpop.f32.mrb[1].mxu0 }
 0x245   :  { %v435_v29 = vmul.f32 0.35355338, %v338_v36  ;;  %v1202_v38 = vpop.f32.mrb[7].mxu1 }
 0x246   :  { %v440_v39 = vadd.f32 %v438_v34, %v436_v35 }
 0x247   :  { %v439_v40 = vadd.f32 %v437_v27, %v435_v29 }
 0x248   :  { %v444_v41 = vsel %vm49_vm0, %v440_v39, -inf }
 0x249   :  { %445 = vmax.xlane.f32.xlu0 %v444_v41  ;;  %v441_v42 = vsel %vm49_vm0, %v439_v40, -inf }
 0x24a   :  { %442 = vmax.xlane.f32.xlu1 %v441_v42 }
 0x25b   :  { %229 = vrot.lane.b32.xlu1 %v1568_v19, %s1468_s20  ;;  %v46_v19 = vld [vmem:[%s1779_s3 + $0x78] sm:$0xff] }
 0x25c   :  { %v1316_v47 = vpack.c.bf16 %v46_v19, %v45_v14 }
 0x25e   :  { %1317 = vmatprep.subr.bf16.mxu1 %v1316_v47 }
 0x25f   :  { %184 = vrot.lane.b32.xlu0 %v182_v43, %s1468_s20  ;;  %234 = vrot.lane.b32.xlu1 %v1557_v17, %s1468_s20 }
 0x260   :  { %1319 = vmatpush3.bf16.msra.mxu1 %v1316_v47 }
 0x261   :  { %1326 = vmatprep.subr.bf16.mxu1 %v1464_v30 }
 0x263   :  { %239 = vrot.lane.b32.xlu0 %v1579_v22, %s1468_s20  ;;  %244 = vrot.lane.b32.xlu1 %v1592_v24, %s1468_s20 }
 0x2d6   :  { %v446_v17 = vpop.xlane.xlu0 %445 }
 0x2d7   :  { %v448_v48 = vsub.f32 %v440_v39, %v446_v17  ;;  %v443_v49 = vpop.xlane.xlu1 %442 }
 0x2d8   :  { %v447_v51 = vsub.f32 %v439_v40, %v443_v49 }
 0x2d9   :  { %v451_v52 = vmul.f32 1.442695, %v448_v48 }
 0x2da   :  { %v449_v53 = vmul.f32 1.442695, %v447_v51  ;;  %v185_v54 = vpop.permute.xlu0 %184 }
 0x2db   :  { %v230_v55 = vpop.permute.xlu1 %229  ;;  %v187_v56 = vadd.f32 %v185_v54, %v154_v32  ;;  %v188_v57 = vadd.f32 %v1191_v31, %v185_v54  ;;  %v1418_v32 = vpack.i.bf16 %v1524_v6, %v1515_v2 }
 0x2dc   :  { %1423 = vpow2.f32 %v449_v53 }
 0x2dd   :  { %1425 = vpow2.f32 %v451_v52  ;;  %v232_v58 = vmul.f32 %v230_v55, %v187_v56  ;;  %v233_v59 = vmul.f32 %v230_v55, %v188_v57 }
 0x2de   :  { %v240_v24 = vpop.permute.xlu0 %239 }
 0x2df   :  { %v235_v22 = vpop.permute.xlu1 %234  ;;  %v242_v3 = vmul.f32 %v240_v24, %v187_v56  ;;  %v243_v8 = vmul.f32 %v240_v24, %v188_v57 }
 0x2e0   :  { %v238_v60 = vmul.f32 %v235_v22, %v188_v57  ;;  %v237_v61 = vmul.f32 %v235_v22, %v187_v56 }
 0x2e2   :  { %v1398_v62 = vpack.i.bf16 %v238_v60, %v233_v59  ;;  %v1393_v63 = vpack.i.bf16 %v237_v61, %v232_v58 }
 0x2e3   :  { %v245_v5 = vpop.permute.xlu1 %244 }
 0x2e4   :  { %v248_v21 = vmul.f32 %v245_v5, %v188_v57  ;;  %v247_v23 = vmul.f32 %v245_v5, %v187_v56  ;;  %1399 = vrot.lane.b32.xlu1 %v1398_v62, %s1468_s20  ;;  %1394 = vrot.lane.b32.xlu0 %v1393_v63, %s1468_s20  ;;  %v719_v56 = vrot.slane %v1540_v10, %v201_v13 }
 0x2e6   :  { %v1424_v25 = vpop.eup %1423  ;;  %v1408_v26 = vpack.i.bf16 %v248_v21, %v243_v8  ;;  %v1403_v28 = vpack.i.bf16 %v247_v23, %v242_v3 }
 0x2e7   :  { %v1426_v31 = vpop.eup %1425  ;;  %1222 = vmatprep.mubr.msk.f32.mxu1 %vm49_vm0, %v1424_v25 }
 0x2e8   :  { %1223 = vmatmul.mubr.msk.f32.vlgmr.msra.gmra.mrb[8].mxu1 %vm49_vm0, %v1426_v31  ;;  %1409 = vrot.lane.b32.xlu1 %v1408_v26, %s1468_s20 }
 0x2e9   :  { %1404 = vrot.lane.b32.xlu0 %v1403_v28, %s1468_s20  ;;  %1244 = vmatprep.mubr.msk.f32.mxu1 %vm1466_vm1, %v1467_v50  ;;  %v32_v28 = vld [vmem:[%s1779_s3 + $0x8] sm:$0xff] }
 0x2ec   :  { %1419 = vrot.lane.b32.xlu1 %v1418_v32, %s1463_s7  ;;  %v33_v32 = vld [vmem:[%s1779_s3 + $0x10] sm:$0xff] }
 0x2ed   :  { %1414 = vrot.lane.b32.xlu0 %v1413_v4, %s1463_s7 }
 0x356   :  { %v1400_v33 = vpop.permute.xlu1 %1399  ;;  %v1395_v34 = vpop.permute.xlu0 %1394 }
 0x357   :  { %v1402_v35 = vunpack.i.h.bf16 %v1400_v33  ;;  %v1401_v36 = vunpack.i.l.bf16 %v1400_v33  ;;  %v1397_v37 = vunpack.i.h.bf16 %v1395_v34  ;;  %v1396_v27 = vunpack.i.l.bf16 %v1395_v34  ;;  %v34_v33 = vld [vmem:[%s1779_s3 + $0x18] sm:$0xff] }
 0x358   :  { %v1344_v34 = vpack.c.bf16 %v34_v33, %v33_v32 }
 0x359   :  { %v1327_v29 = vpack.c.bf16 %v1402_v35, %v1401_v36  ;;  %v1321_v38 = vpack.c.bf16 %v1397_v37, %v1396_v27  ;;  %v35_v35 = vld [vmem:[%s1779_s3 + $0x20] sm:$0xff]  ;;  %v36_v36 = vld [vmem:[%s1779_s3 + $0x28] sm:$0xff]  ;;  %v37_v37 = vld [vmem:[%s1779_s3 + $0x30] sm:$0xff] }
 0x35a   :  { %v1410_v39 = vpop.permute.xlu1 %1409  ;;  %v1348_v27 = vpack.c.bf16 %v36_v36, %v35_v35 }
 0x35b   :  { %v1412_v50 = vunpack.i.h.bf16 %v1410_v39  ;;  %v1411_v40 = vunpack.i.l.bf16 %v1410_v39  ;;  %v1405_v41 = vpop.permute.xlu0 %1404  ;;  %1322 = vmatpush3.bf16.msra.mxu0 %v1321_v38  ;;  %1328 = vmatpush3.bf16.msra.mxu1 %v1327_v29  ;;  %v38_v29 = vld [vmem:[%s1779_s3 + $0x38] sm:$0xff]  ;;  %v39_v39 = vld [vmem:[%s1779_s3 + $0x40] sm:$0xff] }
 0x35c   :  { %v1407_v0 = vunpack.i.h.bf16 %v1405_v41  ;;  %v1406_v1 = vunpack.i.l.bf16 %v1405_v41  ;;  %1323 = vmatprep.subr.bf16.mxu0 %v1464_v30  ;;  %1329 = vmatprep.subr.bf16.mxu1 %v1464_v30  ;;  %v1352_v38 = vpack.c.bf16 %v38_v29, %v37_v37  ;;  %v1064_v37 = vrot.slane %v1545_v11, %v165_v16 }
 0x35d   :  { %v1330_v2 = vpack.c.bf16 %v1412_v50, %v1411_v40  ;;  %v40_v50 = vld [vmem:[%s1779_s3 + $0x48] sm:$0xff] }
 0x35e   :  { %v1324_v4 = vpack.c.bf16 %v1407_v0, %v1406_v1  ;;  %v1420_v14 = vpop.permute.xlu1 %1419  ;;  %v1356_v40 = vpack.c.bf16 %v40_v50, %v39_v39 }
 0x35f   :  { %1331 = vmatpush3.bf16.msra.mxu1 %v1330_v2  ;;  %v1415_v6 = vpop.permute.xlu0 %1414  ;;  %v1422_v19 = vunpack.i.h.bf16 %v1420_v14  ;;  %v1421_v47 = vunpack.i.l.bf16 %v1420_v14 }
 0x360   :  { %1325 = vmatpush3.bf16.msra.mxu0 %v1324_v4  ;;  %v1417_v42 = vunpack.i.h.bf16 %v1415_v6  ;;  %v1416_v43 = vunpack.i.l.bf16 %v1415_v6 }
 0x361   :  { %v1336_v51 = vpack.c.bf16 %v1422_v19, %v1421_v47 }
 0x362   :  { %v1332_v44 = vpack.c.bf16 %v1417_v42, %v1416_v43  ;;  %v848_v42 = vsub.s32 6, %v1535_v9  ;;  %v854_v43 = vsub.s32 7, %v1535_v9 }
 0x364   :  { %1333 = vmatprep.subr.bf16.mxu0 %v1332_v44  ;;  %v855_v14 = vrot.slane %v1540_v10, %v854_v43 }
 0x3bb   :  { %v1224_v45 = vpop.f32.mrb[8].mxu1 }
 0x3bc   :  { %1427 = vrcp.f32 %v1224_v45  ;;  %v525_v46 = vpop.f32.mrb[9].mxu1 }
 0x3bd   :  { %1429 = vrcp.f32 %v525_v46 }
 0x3c6   :  { %v1428_v17 = vpop.eup %1427 }
 0x3c7   :  { %v1430_v48 = vpop.eup %1429  ;;  %v537_v49 = vmul.f32 %v1428_v17, %v1426_v31 }
 0x3c8   :  { %v536_v30 = vmul.f32 %v1430_v48, %v1424_v25 }
 0x3c9   :  { %1245 = vmatmul.mubr.msk.f32.vlgmr.msra.gmra.mrb[10].mxu1 %vm49_vm0, %v537_v49 }
 0x3ca   :  { %1234 = vmatmul.mubr.msk.f32.vlgmr.msra.gmra.mrb[2].mxu0 %vm49_vm0, %v536_v30 }
 0x3cb   :  { %1335 = vmatpush3.bf16.msra.mxu0 %v1332_v44  ;;  %v849_v44 = vrot.slane %v1540_v10, %v848_v42 }
 0x3cc   :  { %1337 = vmatprep.subr.bf16.mxu0 %v1336_v51 }
 0x3cf   :  { %1339 = vmatpush3.bf16.msra.mxu0 %v1336_v51  ;;  %v41_v51 = vld [vmem:[%s1779_s3 + $0x50] sm:$0xff] }
 0x3d0   :  { %1349 = vmatprep.subr.bf16.mxu0 %v1348_v27 }
 0x49c   :  { %v712_v52 = vpop.f32.mrb[10].mxu1 }
 0x49d   :  { %v623_v53 = vpop.f32.mrb[2].mxu0  ;;  %v1246_v54 = vpop.f32.mrb[11].mxu1 }
 0x49e   :  { %v1235_v55 = vpop.f32.mrb[3].mxu0  ;;  %1255 = vmatprep.mubr.msk.f32.mxu0 %vm49_vm0, %v623_v53  ;;  %v861_v54 = vrot.slane %v1540_v10, %v211_v15 }
 0x49f   :  { %1256 = vmatmul.mubr.msk.f32.vlgmr.msra.gmra.mrb[4].mxu0 %vm49_vm0, %v712_v52  ;;  %v42_v52 = vld [vmem:[%s1779_s3 + $0x58] sm:$0xff] }
 0x4a0   :  { %1351 = vmatpush3.bf16.msra.mxu0 %v1348_v27  ;;  %v1360_v53 = vpack.c.bf16 %v42_v52, %v41_v51 }
 0x4a1   :  { %1353 = vmatprep.subr.bf16.mxu0 %v1352_v38 }
 0x4a4   :  { %1355 = vmatpush3.bf16.msra.mxu0 %v1352_v38  ;;  %v1070_v38 = vrot.slane %v1545_v11, %v171_v12 }
 0x4a5   :  { %1357 = vmatprep.subr.bf16.mxu0 %v1356_v40 }
 0x4a8   :  { %1359 = vmatpush3.bf16.msra.mxu0 %v1356_v40 }
 0x4a9   :  { %1361 = vmatprep.subr.bf16.mxu0 %v1360_v53 }
 0x4ac   :  { %1363 = vmatpush3.bf16.msra.mxu0 %v1360_v53 }
 0x572   :  { %v1257_v57 = vpop.f32.mrb[4].mxu0 }
 0x573   :  { %v814_v22 = vadd.f32 %v1257_v57, %v719_v56  ;;  %v808_v58 = vpop.f32.mrb[5].mxu0 }
 0x574   :  { %v809_v59 = vadd.f32 %v808_v58, %v719_v56 }
 0x575   :  { %v818_v24 = vadd.f32 %v814_v22, %v1562_v18 }
 0x576   :  { %v817_v60 = vadd.f32 %v809_v59, %v1529_v7  ;;  %v31_v7 = vld [vmem:[%s1779_s3] sm:$0xff]  ;;  %s1469_s3 = smov [#allocation2]  }
 0x577   :  { %v822_v61 = vsel %vm49_vm0, %v818_v24, 0.0  ;;  %v1340_v31 = vpack.c.bf16 %v32_v28, %v31_v7  ;;  %s1080_s23 = sshll.u32 %s1469_s3, 4  ;;  %s1081_s23 = int_to_ptr.vmem [resolvable:$true] %s1080_s23 }
 0x578   :  { %823 = vadd.xlane.f32.xlu1 %v822_v61  ;;  %v819_v62 = vsel %vm49_vm0, %v817_v60, 0.0  ;;  %s1439_s24 = scalar_lea.vmem %s1081_s23, 256  ;;  %p1444_p1 = scmp.lt.s32.totalorder %s1081_s23, %s1081_s23 }
 0x579   :  { %820 = vadd.xlane.f32.xlu0 %v819_v62  ;;  %1341 = vmatprep.subr.bf16.mxu1 %v1340_v31  ;;  %p1440_p0 = scmp.ne.s32.totalorder %s1081_s23, %s1439_s24  ;;  %p1445_p2 = scmp.lt.s32.totalorder %s1439_s24, %s1439_s24 }
 0x57a   :  { %1343 = vmatpush3.bf16.msra.mxu1 %v1340_v31 }
 0x57b   :  { %1345 = vmatprep.subr.bf16.mxu1 %v1344_v34  ;;  %p1446_p3 = por %p1445_p2, %p1444_p1 }
 0x57d   :  { %p1447_p4 = pnand %p1446_p3, %p1440_p0 }
 0x57e   :  { %1347 = vmatpush3.bf16.msra.mxu1 %v1344_v34 }
 0x605   :  { %v824_v63 = vpop.xlane.xlu1 %823 }
 0x606   :  { %v827_v3 = vmul.f32 0.03125, %v824_v63  ;;  %v821_v5 = vpop.xlane.xlu0 %820 }
 0x607   :  { %v826_v8 = vmul.f32 0.03125, %v821_v5 }
 0x608   :  { %v829_v21 = vsub.f32 %v818_v24, %v827_v3  ;;  %v1032_v24 = vrot.slane %v1540_v10, %v221_v20 }
 0x609   :  { %v828_v13 = vsub.f32 %v817_v60, %v826_v8 }
 0x60a   :  { %v831_v26 = vmul.f32 %v829_v21, %v829_v21 }
 0x60b   :  { %v830_v23 = vmul.f32 %v828_v13, %v828_v13 }
 0x60c   :  { %v835_v18 = vsel %vm49_vm0, %v831_v26, 0.0 }
 0x60d   :  { %v832_v25 = vsel %vm49_vm0, %v830_v23, 0.0 }
 0x60e   :  { %833 = vadd.xlane.f32.xlu0 %v832_v25 }
 0x612   :  { %836 = vadd.xlane.f32.xlu0 %v835_v18 }
 0x69b   :  { %v834_v41 = vpop.xlane.xlu0 %833 }
 0x69c   :  { %v838_v0 = vmul.f32 0.03125, %v834_v41 }
 0x69e   :  { %v840_v1 = vadd.f32 1e-05, %v838_v0 }
 0x69f   :  { %v837_v2 = vpop.xlane.xlu0 %836 }
 0x6a0   :  { %1431 = vrsqrt.f32 %v840_v1  ;;  %v839_v4 = vmul.f32 0.03125, %v837_v2 }
 0x6a2   :  { %v841_v6 = vadd.f32 1e-05, %v839_v4 }
 0x6a4   :  { %1433 = vrsqrt.f32 %v841_v6 }
 0x6aa   :  { %v1432_v45 = vpop.eup %1431 }
 0x6ab   :  { %v844_v46 = vmul.f32 %v1432_v45, %v828_v13 }
 0x6ad   :  { %v850_v19 = vmul.f32 %v849_v44, %v844_v46 }
 0x6ae   :  { %v1434_v47 = vpop.eup %1433 }
 0x6af   :  { %v845_v17 = vmul.f32 %v1434_v47, %v829_v21  ;;  %v856_v48 = vadd.f32 %v855_v14, %v850_v19 }
 0x6b1   :  { %v851_v49 = vmul.f32 %v849_v44, %v845_v17  ;;  %1266 = vmatprep.mubr.msk.f32.mxu1 %vm49_vm0, %v856_v48 }
 0x6b3   :  { %v857_v30 = vadd.f32 %v855_v14, %v851_v49 }
 0x6b5   :  { %1267 = vmatmul.mubr.msk.f32.vlgmr.msra.gmra.mrb[12].mxu1 %vm49_vm0, %v857_v30 }
 0x788   :  { %v1268_v55 = vpop.f32.mrb[12].mxu1 }
 0x789   :  { %v940_v56 = vadd.f32 %v1268_v55, %v861_v54  ;;  %v934_v57 = vpop.f32.mrb[13].mxu1 }
 0x78a   :  { %v935_v22 = vadd.f32 %v934_v57, %v861_v54 }
 0x78b   :  { %v944_v59 = vmax.f32 %v940_v56, 0.0 }
 0x78c   :  { %v943_v58 = vmax.f32 %v935_v22, 0.0 }
 0x78e   :  { %1285 = vmatprep.mubr.msk.f32.mxu0 %vm945_vm3, %v943_v58 }
 0x78f   :  { %1286 = vmatmul.mubr.msk.f32.vlgmr.msra.gmra.mrb[6].mxu0 %vm945_vm3, %v944_v59 }
 0x862   :  { %v1287_v60 = vpop.f32.mrb[6].mxu0 }
 0x863   :  { %v1028_v61 = vadd.f32 %v1287_v60, %v857_v30  ;;  %v1018_v62 = vpop.f32.mrb[7].mxu0 }
 0x864   :  { %v1027_v63 = vadd.f32 %v1018_v62, %v856_v48 }
 0x865   :  { %v1034_v3 = vadd.f32 %v1032_v24, %v1028_v61 }
 0x866   :  { %v1033_v5 = vadd.f32 %v1032_v24, %v1027_v63 }
 0x867   :  { %v1038_v15 = vsel %vm49_vm0, %v1034_v3, 0.0 }
 0x868   :  { %1039 = vadd.xlane.f32.xlu0 %v1038_v15  ;;  %v1035_v8 = vsel %vm49_vm0, %v1033_v5, 0.0 }
 0x869   :  { %1036 = vadd.xlane.f32.xlu1 %v1035_v8 }
 0x8f5   :  { %v1040_v21 = vpop.xlane.xlu0 %1039 }
 0x8f6   :  { %v1042_v13 = vmul.f32 0.03125, %v1040_v21  ;;  %v1037_v23 = vpop.xlane.xlu1 %1036 }
 0x8f7   :  { %v1041_v25 = vmul.f32 0.03125, %v1037_v23 }
 0x8f8   :  { %v1044_v26 = vsub.f32 %v1034_v3, %v1042_v13 }
 0x8f9   :  { %v1043_v18 = vsub.f32 %v1033_v5, %v1041_v25 }
 0x8fa   :  { %v1046_v7 = vmul.f32 %v1044_v26, %v1044_v26 }
 0x8fb   :  { %v1045_v10 = vmul.f32 %v1043_v18, %v1043_v18 }
 0x8fc   :  { %v1050_v20 = vsel %vm49_vm0, %v1046_v7, 0.0 }
 0x8fd   :  { %1051 = vadd.xlane.f32.xlu0 %v1050_v20  ;;  %v1047_v28 = vsel %vm49_vm0, %v1045_v10, 0.0 }
 0x8fe   :  { %1048 = vadd.xlane.f32.xlu1 %v1047_v28 }
 0x98a   :  { %v1052_v31 = vpop.xlane.xlu0 %1051 }
 0x98b   :  { %v1054_v32 = vmul.f32 0.03125, %v1052_v31  ;;  %v1049_v33 = vpop.xlane.xlu1 %1048 }
 0x98c   :  { %v1053_v34 = vmul.f32 0.03125, %v1049_v33 }
 0x98d   :  { %v1056_v35 = vadd.f32 1e-05, %v1054_v32 }
 0x98e   :  { %v1055_v36 = vadd.f32 1e-05, %v1053_v34 }
 0x98f   :  { %1435 = vrsqrt.f32 %v1056_v35 }
 0x990   :  { %1437 = vrsqrt.f32 %v1055_v36 }
 0x999   :  { %v1436_v27 = vpop.eup %1435 }
 0x99a   :  { %v1438_v29 = vpop.eup %1437  ;;  %v1060_v39 = vmul.f32 %v1436_v27, %v1044_v26 }
 0x99b   :  { %v1059_v50 = vmul.f32 %v1438_v29, %v1043_v18 }
 0x99c   :  { %v1066_v40 = vmul.f32 %v1064_v37, %v1060_v39 }
 0x99d   :  { %v1065_v41 = vmul.f32 %v1064_v37, %v1059_v50 }
 0x99e   :  { %v1072_v0 = vadd.f32 %v1070_v38, %v1066_v40 }
 0x99f   :  { %v1071_v1 = vadd.f32 %v1070_v38, %v1065_v41 }
 0x9a0   :  { %1074 = vst.msk [vmem:[#allocation2 + $0x8] sm:$0xff] %vm49_vm0, %v1072_v0 }
 0x9a1   :  { %1073 = vst.msk [vmem:[#allocation2] sm:$0xff] %vm49_vm0, %v1071_v1 }
 0x9a2   :  { %1450 = shalt.err (!%p1447_p4)
}
 0x9a3   :  { %s1451_s27 = scalar_lea.hbm %s1781_s5, 256 }
 0x9a4   :  { %p1452_p5 = scmp.ne.s32.totalorder %s1781_s5, %s1451_s27  ;;  %p1455_p6 = scmp.lt.u32.totalorder %s1451_s27, %s1781_s5 }
 0x9a6   :  { %p1457_p7 = pnand %p1455_p6, %p1452_p5 }
 0x9a8   :  { %1460 = shalt.err (!%p1457_p7)
}
 0x9a9   :  { %s1470_s4 = smov 128   ;;  %s1471_s6 = smov 8  }
 0x9aa   :  { %1086 = dma.vmem_to_hbm [thread:$0]  %s1081_s23, 256, %s1781_s5, [#allocation3], %s1470_s4, %s1470_s4, %s1471_s6  }
 0x9ab   :  { %1461 = dma.done.wait [#allocation3], 256  }
 0x9ac   :  { %1462 = vsyncadd [#allocation3], 4294967040 }
 0x9ad   :  { %1090 = vsyncpa [#allocation3], 1 }

</bundles_post_ra>
